<compile_context>
chip_gen: v5e
topology: v5e:2x2
jax: 0.10.0
libtpu: 0.0.40
codegen_flags: <defaults>
</compile_context>

<pallas_src>
import jax
import jax.numpy as jnp
from jax.experimental import pallas as pl
from jax.experimental.pallas import tpu as pltpu

# ----- hyperparameters (small, consistent with the module's __init__) -----
NUM_MELS    = 16   # hp.embedder_num_mels
LSTM_HIDDEN = 32   # hp.embedder_lstm_hidden
EMB_DIM     = 16   # hp.embedder_emb_dim
WINDOW      = 8    # hp.embedder_window
STRIDE      = 4    # hp.embedder_stride
NUM_LAYERS  = 2    # hp.embedder_lstm_layers
T_FRAMES    = 36   # mel time length -> num_frames = (36 - 8)//4 + 1 = 8
LANES       = 4 * LSTM_HIDDEN   # 128 = one full vreg of lanes; also the slab width


def _slab_layout(num_mels, hidden, num_layers):
    """Row layout of the packed parameter slab (every section starts 8-row aligned)."""
    def pad8(n):
        return -(-n // 8) * 8
    entries = []
    for l in range(num_layers):
        in_l = num_mels if l == 0 else hidden
        entries += [(f"w_ih{l}", in_l), (f"w_hh{l}", hidden), (f"b{l}", 1)]
    entries += [("proj_w", hidden), ("proj_b", 1)]
    layout, row = {}, 0
    for name, n in entries:
        layout[name] = (row, n)
        row += pad8(n)
    return layout, row


def make_speech_embedder_kernel(num_layers, window, num_frames, hidden, stride, layout):
    """Builds the Pallas kernel (fully unrolled over layers and time steps)."""
    F, W, H, S = num_frames, window, hidden, stride

    def kernel(mel_ref, params_ref, out_ref):
        # mel_ref:    (T, num_mels)        raw mel, time-major
        # params_ref: (rows, 4H=128)       packed, pre-scaled parameter slab
        # out_ref:    (1, 128)             lane-dense output row (emb in first EMB_DIM lanes)

        def P(name):
            off, n = layout[name]
            return params_ref[off:off + n, :]          # aligned static slice -> load

        # Constants for the fused activation (hoisted; gate order i, f, g, o).
        ones = jnp.full((F, H), 1.0, jnp.float32)
        half = jnp.full((F, H), 0.5, jnp.float32)
        zero = jnp.zeros((F, H), jnp.float32)
        post_m = jnp.concatenate([half, half, ones, half], axis=1)   # (F, 4H)
        post_a = jnp.concatenate([half, half, zero, half], axis=1)   # (F, 4H)

        h = None
        h_steps = []
        for l in range(num_layers):
            # ---- batched input projection for ALL timesteps (off the serial chain) ----
            if l == 0:
                # Gather timestep-major window batch straight from the raw mel with
                # strided ref reads (replaces the host-side unfold/permute).
                x = jnp.concatenate(
                    [mel_ref[pl.ds(t, F, stride=S), :] for t in range(W)], axis=0)
            else:
                x = jnp.concatenate(h_steps, axis=0)                  # (W*F, H)
            gx = (jnp.dot(x, P(f"w_ih{l}"), preferred_element_type=jnp.float32)
                  + P(f"b{l}"))                                       # (W*F, 4H)

            w_hh = P(f"w_hh{l}")                                      # (H, 4H)
            h = jnp.zeros((F, H), jnp.float32)
            c = jnp.zeros((F, H), jnp.float32)
            h_steps = []
            for t in range(W):
                gates = gx[t * F:(t + 1) * F, :] + jnp.dot(
                    h, w_hh, preferred_element_type=jnp.float32)       # (F, 4H)
                # Weights/bias for i/f/o columns were pre-scaled by 0.5 when packing,
                # so sigmoid(x) == 0.5*tanh(gates)+0.5 and tanh(g) is untouched:
                act = jnp.tanh(gates) * post_m + post_a
                i_g = act[:, 0 * H:1 * H]
                f_g = act[:, 1 * H:2 * H]
                g_g = act[:, 2 * H:3 * H]
                o_g = act[:, 3 * H:4 * H]
                c = f_g * c + i_g * g_g
                h = o_g * jnp.tanh(c)
                if l < num_layers - 1:
                    h_steps.append(h)   # kept live in vregs; no VMEM scratch round-trip

        # x[:, -1, :] is `h` after the final timestep of the last layer.
        # proj_w / proj_b are zero-padded to 128 lanes, so lanes >= EMB_DIM stay 0.
        e = (jnp.dot(h, P("proj_w"), preferred_element_type=jnp.float32)
             + P("proj_b"))                                            # (F, 128)
        inv = jax.lax.rsqrt(jnp.sum(e * e, axis=1, keepdims=True))     # L2 over dim=1
        e = e * inv
        out_ref[...] = jnp.sum(e, axis=0, keepdims=True) * (1.0 / F)   # frame mean

    return kernel


def init_params(key):
    """Deterministic synthetic parameters matching nn.LSTM / nn.Linear shapes."""
    params = {'lstm': []}
    for l in range(NUM_LAYERS):
        in_l = NUM_MELS if l == 0 else LSTM_HIDDEN
        key, k1, k2, k3, k4 = jax.random.split(key, 5)
        # PyTorch stores weight_ih (4H, in), weight_hh (4H, H); we keep transposed.
        w_ih = 0.2 * jax.random.normal(k1, (in_l, 4 * LSTM_HIDDEN), jnp.float32)
        w_hh = 0.2 * jax.random.normal(k2, (LSTM_HIDDEN, 4 * LSTM_HIDDEN), jnp.float32)
        b_ih = 0.1 * jax.random.normal(k3, (4 * LSTM_HIDDEN,), jnp.float32)
        b_hh = 0.1 * jax.random.normal(k4, (4 * LSTM_HIDDEN,), jnp.float32)
        params['lstm'].append((w_ih, w_hh, (b_ih + b_hh)[None, :]))
    key, k1, k2 = jax.random.split(key, 3)
    params['proj_w'] = 0.2 * jax.random.normal(k1, (LSTM_HIDDEN, EMB_DIM), jnp.float32)
    params['proj_b'] = 0.1 * jax.random.normal(k2, (1, EMB_DIM), jnp.float32)
    return params


def pack_params(params):
    """Pack all parameters into one lane-dense (rows, 128) f32 slab (one DMA).

    The i/f/o gate columns of the LSTM weights/bias are pre-scaled by 0.5 so the
    kernel can evaluate sigmoid via a single full-vreg tanh (sigmoid(x)=0.5*tanh(x/2)+0.5).
    Done once at parameter-preparation time, not per forward call.
    """
    H = LSTM_HIDDEN
    layout, rows = _slab_layout(NUM_MELS, H, NUM_LAYERS)
    gate_scale = jnp.concatenate([jnp.full((H,), 0.5), jnp.full((H,), 0.5),
                                  jnp.ones((H,)), jnp.full((H,), 0.5)]).astype(jnp.float32)
    slab = jnp.zeros((rows, LANES), jnp.float32)

    def put(name, arr):
        off, n = layout[name]
        return slab.at[off:off + n, :arr.shape[1]].set(arr.astype(jnp.float32))

    for l in range(NUM_LAYERS):
        w_ih, w_hh, b = params['lstm'][l]
        slab = put(f"w_ih{l}", w_ih * gate_scale)
        slab = put(f"w_hh{l}", w_hh * gate_scale)
        slab = put(f"b{l}", b * gate_scale)
    slab = put("proj_w", params['proj_w'])
    slab = put("proj_b", params['proj_b'])
    return slab, layout


def speech_embedder_forward(mel, param_slab, layout):
    mel_tm = jnp.transpose(mel.astype(jnp.float32))          # (T, num_mels) time-major
    num_frames = (mel_tm.shape[0] - WINDOW) // STRIDE + 1

    kernel = make_speech_embedder_kernel(
        NUM_LAYERS, WINDOW, num_frames, LSTM_HIDDEN, STRIDE, layout)

    vmem = pl.BlockSpec(memory_space=pltpu.MemorySpace.VMEM)
    out = pl.pallas_call(
        kernel,
        out_shape=jax.ShapeDtypeStruct((1, LANES), jnp.float32),   # lane-dense output
        in_specs=[vmem, vmem],
        out_specs=vmem,
    )(mel_tm, param_slab)
    return out[0, :EMB_DIM]
    # TODO(synk): batching multiple utterances per pallas_call (frame-axis stacking +
    # a "parallel" grid axis for the 2 TCs on v7x) would fill the MXU; single-mel here
    # to match the module's forward signature.


def reference_forward(mel, params):
    """Pure-JAX reference mirroring the PyTorch forward semantics (unscaled params)."""
    mel = mel.astype(jnp.float32)
    num_frames = (mel.shape[1] - WINDOW) // STRIDE + 1
    frames = jnp.stack([mel[:, f * STRIDE: f * STRIDE + WINDOW] for f in range(num_frames)],
                       axis=0)                                   # (F, M, W)
    x_seq = jnp.transpose(frames, (2, 0, 1))                     # (W, F, M) time-major
    H = LSTM_HIDDEN
    for l in range(NUM_LAYERS):
        w_ih, w_hh, b = params['lstm'][l]
        h = jnp.zeros((num_frames, H), jnp.float32)
        c = jnp.zeros_like(h)
        outs = []
        for t in range(WINDOW):
            g = x_seq[t] @ w_ih + h @ w_hh + b
            i_g = jax.nn.sigmoid(g[:, 0 * H:1 * H])
            f_g = jax.nn.sigmoid(g[:, 1 * H:2 * H])
            g_g = jnp.tanh(      g[:, 2 * H:3 * H])
            o_g = jax.nn.sigmoid(g[:, 3 * H:4 * H])
            c = f_g * c + i_g * g_g
            h = o_g * jnp.tanh(c)
            outs.append(h)
        x_seq = jnp.stack(outs, axis=0)
    e = x_seq[-1] @ params['proj_w'] + params['proj_b']
    e = e / jnp.sqrt(jnp.sum(e * e, axis=1, keepdims=True))
    return jnp.sum(e, axis=0) / num_frames


if __name__ == "__main__":
    key = jax.random.PRNGKey(0)
    key, pkey, mkey = jax.random.split(key, 3)
    params = init_params(pkey)
    mel = jax.random.normal(mkey, (NUM_MELS, T_FRAMES), jnp.float32)

    param_slab, layout = pack_params(params)   # one-time parameter packing (single DMA)

    out = speech_embedder_forward(mel, param_slab, layout)
    out = jax.block_until_ready(out)

    ref = reference_forward(mel, params)
    assert out.shape == (EMB_DIM,)
    assert jnp.allclose(out, ref, rtol=1e-3, atol=1e-3), (out, ref)
    print("KERNEL_OK")
</pallas_src>

<mosaic_0001>
module attributes {stable_mosaic.version = 11 : i64} {
  func.func @kernel(%arg0: memref<36x16xf32, #tpu.memory_space<vmem>>, %arg1: memref<168x128xf32, #tpu.memory_space<vmem>>, %arg2: memref<1x128xf32, #tpu.memory_space<vmem>>) attributes {dimension_semantics = [], scalar_prefetch = 0 : i64, scratch_operands = 0 : i64, tpu.core_type = #tpu.core_type<tc>} {
    %cst = arith.constant 1.000000e+00 : f32
    %0 = vector.broadcast %cst : f32 to vector<8x32xf32>
    %cst_0 = arith.constant 5.000000e-01 : f32
    %1 = vector.broadcast %cst_0 : f32 to vector<8x32xf32>
    %cst_1 = arith.constant 0.000000e+00 : f32
    %2 = vector.broadcast %cst_1 : f32 to vector<8x32xf32>
    %3 = tpu.concatenate %1, %1, %0, %1 in 1 : vector<8x32xf32>, vector<8x32xf32>, vector<8x32xf32>, vector<8x32xf32> -> vector<8x128xf32>
    %4 = tpu.concatenate %1, %1, %2, %1 in 1 : vector<8x32xf32>, vector<8x32xf32>, vector<8x32xf32>, vector<8x32xf32> -> vector<8x128xf32>
    %c0 = arith.constant 0 : index
    %c0_2 = arith.constant 0 : index
    %5 = tpu.strided_load %arg0[%c0, %c0_2] {strides = array<i32: 4, 1>} : memref<36x16xf32, #tpu.memory_space<vmem>>, vector<8x16xf32>
    %c1 = arith.constant 1 : index
    %c0_3 = arith.constant 0 : index
    %6 = tpu.strided_load %arg0[%c1, %c0_3] {strides = array<i32: 4, 1>} : memref<36x16xf32, #tpu.memory_space<vmem>>, vector<8x16xf32>
    %c2 = arith.constant 2 : index
    %c0_4 = arith.constant 0 : index
    %7 = tpu.strided_load %arg0[%c2, %c0_4] {strides = array<i32: 4, 1>} : memref<36x16xf32, #tpu.memory_space<vmem>>, vector<8x16xf32>
    %c3 = arith.constant 3 : index
    %c0_5 = arith.constant 0 : index
    %8 = tpu.strided_load %arg0[%c3, %c0_5] {strides = array<i32: 4, 1>} : memref<36x16xf32, #tpu.memory_space<vmem>>, vector<8x16xf32>
    %c4 = arith.constant 4 : index
    %c0_6 = arith.constant 0 : index
    %9 = tpu.strided_load %arg0[%c4, %c0_6] {strides = array<i32: 4, 1>} : memref<36x16xf32, #tpu.memory_space<vmem>>, vector<8x16xf32>
    %c5 = arith.constant 5 : index
    %c0_7 = arith.constant 0 : index
    %10 = tpu.strided_load %arg0[%c5, %c0_7] {strides = array<i32: 4, 1>} : memref<36x16xf32, #tpu.memory_space<vmem>>, vector<8x16xf32>
    %c6 = arith.constant 6 : index
    %c0_8 = arith.constant 0 : index
    %11 = tpu.strided_load %arg0[%c6, %c0_8] {strides = array<i32: 4, 1>} : memref<36x16xf32, #tpu.memory_space<vmem>>, vector<8x16xf32>
    %c7 = arith.constant 7 : index
    %c0_9 = arith.constant 0 : index
    %12 = tpu.strided_load %arg0[%c7, %c0_9] {strides = array<i32: 4, 1>} : memref<36x16xf32, #tpu.memory_space<vmem>>, vector<8x16xf32>
    %13 = tpu.concatenate %5, %6, %7, %8, %9, %10, %11, %12 in 0 : vector<8x16xf32>, vector<8x16xf32>, vector<8x16xf32>, vector<8x16xf32>, vector<8x16xf32>, vector<8x16xf32>, vector<8x16xf32>, vector<8x16xf32> -> vector<64x16xf32>
    %c0_10 = arith.constant 0 : index
    %c0_11 = arith.constant 0 : index
    %14 = vector.load %arg1[%c0_10, %c0_11] : memref<168x128xf32, #tpu.memory_space<vmem>>, vector<16x128xf32>
    %cst_12 = arith.constant dense<0.000000e+00> : vector<64x128xf32>
    %15 = tpu.matmul %13, %14, %cst_12 {dimension_numbers = #tpu.dot_dimension_numbers<[1], [0], [0], [1], [0, 0, 1, 1], [], []>} : vector<64x16xf32>, vector<16x128xf32>, vector<64x128xf32> -> vector<64x128xf32>
    %c48 = arith.constant 48 : index
    %c0_13 = arith.constant 0 : index
    %16 = vector.load %arg1[%c48, %c0_13] : memref<168x128xf32, #tpu.memory_space<vmem>>, vector<1x128xf32>
    %17 = vector.broadcast %16 : vector<1x128xf32> to vector<64x128xf32>
    %18 = arith.addf %15, %17 : vector<64x128xf32>
    %c16 = arith.constant 16 : index
    %c0_14 = arith.constant 0 : index
    %19 = vector.load %arg1[%c16, %c0_14] : memref<168x128xf32, #tpu.memory_space<vmem>>, vector<32x128xf32>
    %cst_15 = arith.constant 0.000000e+00 : f32
    %20 = vector.broadcast %cst_15 : f32 to vector<8x32xf32>
    %cst_16 = arith.constant 0.000000e+00 : f32
    %21 = vector.broadcast %cst_16 : f32 to vector<8x32xf32>
    %22 = vector.extract_strided_slice %18 {offsets = [0, 0], sizes = [8, 128], strides = [1, 1]} : vector<64x128xf32> to vector<8x128xf32>
    %cst_17 = arith.constant dense<0.000000e+00> : vector<8x128xf32>
    %23 = tpu.matmul %20, %19, %cst_17 {dimension_numbers = #tpu.dot_dimension_numbers<[1], [0], [0], [1], [0, 0, 1, 1], [], []>} : vector<8x32xf32>, vector<32x128xf32>, vector<8x128xf32> -> vector<8x128xf32>
    %24 = arith.addf %22, %23 : vector<8x128xf32>
    %25 = math.tanh %24 : vector<8x128xf32>
    %26 = arith.mulf %25, %3 : vector<8x128xf32>
    %27 = arith.addf %26, %4 : vector<8x128xf32>
    %28 = vector.extract_strided_slice %27 {offsets = [0, 0], sizes = [8, 32], strides = [1, 1]} : vector<8x128xf32> to vector<8x32xf32>
    %29 = vector.extract_strided_slice %27 {offsets = [0, 32], sizes = [8, 32], strides = [1, 1]} : vector<8x128xf32> to vector<8x32xf32>
    %30 = vector.extract_strided_slice %27 {offsets = [0, 64], sizes = [8, 32], strides = [1, 1]} : vector<8x128xf32> to vector<8x32xf32>
    %31 = vector.extract_strided_slice %27 {offsets = [0, 96], sizes = [8, 32], strides = [1, 1]} : vector<8x128xf32> to vector<8x32xf32>
    %32 = arith.mulf %29, %21 : vector<8x32xf32>
    %33 = arith.mulf %28, %30 : vector<8x32xf32>
    %34 = arith.addf %32, %33 : vector<8x32xf32>
    %35 = math.tanh %34 : vector<8x32xf32>
    %36 = arith.mulf %31, %35 : vector<8x32xf32>
    %37 = vector.extract_strided_slice %18 {offsets = [8, 0], sizes = [8, 128], strides = [1, 1]} : vector<64x128xf32> to vector<8x128xf32>
    %cst_18 = arith.constant dense<0.000000e+00> : vector<8x128xf32>
    %38 = tpu.matmul %36, %19, %cst_18 {dimension_numbers = #tpu.dot_dimension_numbers<[1], [0], [0], [1], [0, 0, 1, 1], [], []>} : vector<8x32xf32>, vector<32x128xf32>, vector<8x128xf32> -> vector<8x128xf32>
    %39 = arith.addf %37, %38 : vector<8x128xf32>
    %40 = math.tanh %39 : vector<8x128xf32>
    %41 = arith.mulf %40, %3 : vector<8x128xf32>
    %42 = arith.addf %41, %4 : vector<8x128xf32>
    %43 = vector.extract_strided_slice %42 {offsets = [0, 0], sizes = [8, 32], strides = [1, 1]} : vector<8x128xf32> to vector<8x32xf32>
    %44 = vector.extract_strided_slice %42 {offsets = [0, 32], sizes = [8, 32], strides = [1, 1]} : vector<8x128xf32> to vector<8x32xf32>
    %45 = vector.extract_strided_slice %42 {offsets = [0, 64], sizes = [8, 32], strides = [1, 1]} : vector<8x128xf32> to vector<8x32xf32>
    %46 = vector.extract_strided_slice %42 {offsets = [0, 96], sizes = [8, 32], strides = [1, 1]} : vector<8x128xf32> to vector<8x32xf32>
    %47 = arith.mulf %44, %34 : vector<8x32xf32>
    %48 = arith.mulf %43, %45 : vector<8x32xf32>
    %49 = arith.addf %47, %48 : vector<8x32xf32>
    %50 = math.tanh %49 : vector<8x32xf32>
    %51 = arith.mulf %46, %50 : vector<8x32xf32>
    %52 = vector.extract_strided_slice %18 {offsets = [16, 0], sizes = [8, 128], strides = [1, 1]} : vector<64x128xf32> to vector<8x128xf32>
    %cst_19 = arith.constant dense<0.000000e+00> : vector<8x128xf32>
    %53 = tpu.matmul %51, %19, %cst_19 {dimension_numbers = #tpu.dot_dimension_numbers<[1], [0], [0], [1], [0, 0, 1, 1], [], []>} : vector<8x32xf32>, vector<32x128xf32>, vector<8x128xf32> -> vector<8x128xf32>
    %54 = arith.addf %52, %53 : vector<8x128xf32>
    %55 = math.tanh %54 : vector<8x128xf32>
    %56 = arith.mulf %55, %3 : vector<8x128xf32>
    %57 = arith.addf %56, %4 : vector<8x128xf32>
    %58 = vector.extract_strided_slice %57 {offsets = [0, 0], sizes = [8, 32], strides = [1, 1]} : vector<8x128xf32> to vector<8x32xf32>
    %59 = vector.extract_strided_slice %57 {offsets = [0, 32], sizes = [8, 32], strides = [1, 1]} : vector<8x128xf32> to vector<8x32xf32>
    %60 = vector.extract_strided_slice %57 {offsets = [0, 64], sizes = [8, 32], strides = [1, 1]} : vector<8x128xf32> to vector<8x32xf32>
    %61 = vector.extract_strided_slice %57 {offsets = [0, 96], sizes = [8, 32], strides = [1, 1]} : vector<8x128xf32> to vector<8x32xf32>
    %62 = arith.mulf %59, %49 : vector<8x32xf32>
    %63 = arith.mulf %58, %60 : vector<8x32xf32>
    %64 = arith.addf %62, %63 : vector<8x32xf32>
    %65 = math.tanh %64 : vector<8x32xf32>
    %66 = arith.mulf %61, %65 : vector<8x32xf32>
    %67 = vector.extract_strided_slice %18 {offsets = [24, 0], sizes = [8, 128], strides = [1, 1]} : vector<64x128xf32> to vector<8x128xf32>
    %cst_20 = arith.constant dense<0.000000e+00> : vector<8x128xf32>
    %68 = tpu.matmul %66, %19, %cst_20 {dimension_numbers = #tpu.dot_dimension_numbers<[1], [0], [0], [1], [0, 0, 1, 1], [], []>} : vector<8x32xf32>, vector<32x128xf32>, vector<8x128xf32> -> vector<8x128xf32>
    %69 = arith.addf %67, %68 : vector<8x128xf32>
    %70 = math.tanh %69 : vector<8x128xf32>
    %71 = arith.mulf %70, %3 : vector<8x128xf32>
    %72 = arith.addf %71, %4 : vector<8x128xf32>
    %73 = vector.extract_strided_slice %72 {offsets = [0, 0], sizes = [8, 32], strides = [1, 1]} : vector<8x128xf32> to vector<8x32xf32>
    %74 = vector.extract_strided_slice %72 {offsets = [0, 32], sizes = [8, 32], strides = [1, 1]} : vector<8x128xf32> to vector<8x32xf32>
    %75 = vector.extract_strided_slice %72 {offsets = [0, 64], sizes = [8, 32], strides = [1, 1]} : vector<8x128xf32> to vector<8x32xf32>
    %76 = vector.extract_strided_slice %72 {offsets = [0, 96], sizes = [8, 32], strides = [1, 1]} : vector<8x128xf32> to vector<8x32xf32>
    %77 = arith.mulf %74, %64 : vector<8x32xf32>
    %78 = arith.mulf %73, %75 : vector<8x32xf32>
    %79 = arith.addf %77, %78 : vector<8x32xf32>
    %80 = math.tanh %79 : vector<8x32xf32>
    %81 = arith.mulf %76, %80 : vector<8x32xf32>
    %82 = vector.extract_strided_slice %18 {offsets = [32, 0], sizes = [8, 128], strides = [1, 1]} : vector<64x128xf32> to vector<8x128xf32>
    %cst_21 = arith.constant dense<0.000000e+00> : vector<8x128xf32>
    %83 = tpu.matmul %81, %19, %cst_21 {dimension_numbers = #tpu.dot_dimension_numbers<[1], [0], [0], [1], [0, 0, 1, 1], [], []>} : vector<8x32xf32>, vector<32x128xf32>, vector<8x128xf32> -> vector<8x128xf32>
    %84 = arith.addf %82, %83 : vector<8x128xf32>
    %85 = math.tanh %84 : vector<8x128xf32>
    %86 = arith.mulf %85, %3 : vector<8x128xf32>
    %87 = arith.addf %86, %4 : vector<8x128xf32>
    %88 = vector.extract_strided_slice %87 {offsets = [0, 0], sizes = [8, 32], strides = [1, 1]} : vector<8x128xf32> to vector<8x32xf32>
    %89 = vector.extract_strided_slice %87 {offsets = [0, 32], sizes = [8, 32], strides = [1, 1]} : vector<8x128xf32> to vector<8x32xf32>
    %90 = vector.extract_strided_slice %87 {offsets = [0, 64], sizes = [8, 32], strides = [1, 1]} : vector<8x128xf32> to vector<8x32xf32>
    %91 = vector.extract_strided_slice %87 {offsets = [0, 96], sizes = [8, 32], strides = [1, 1]} : vector<8x128xf32> to vector<8x32xf32>
    %92 = arith.mulf %89, %79 : vector<8x32xf32>
    %93 = arith.mulf %88, %90 : vector<8x32xf32>
    %94 = arith.addf %92, %93 : vector<8x32xf32>
    %95 = math.tanh %94 : vector<8x32xf32>
    %96 = arith.mulf %91, %95 : vector<8x32xf32>
    %97 = vector.extract_strided_slice %18 {offsets = [40, 0], sizes = [8, 128], strides = [1, 1]} : vector<64x128xf32> to vector<8x128xf32>
    %cst_22 = arith.constant dense<0.000000e+00> : vector<8x128xf32>
    %98 = tpu.matmul %96, %19, %cst_22 {dimension_numbers = #tpu.dot_dimension_numbers<[1], [0], [0], [1], [0, 0, 1, 1], [], []>} : vector<8x32xf32>, vector<32x128xf32>, vector<8x128xf32> -> vector<8x128xf32>
    %99 = arith.addf %97, %98 : vector<8x128xf32>
    %100 = math.tanh %99 : vector<8x128xf32>
    %101 = arith.mulf %100, %3 : vector<8x128xf32>
    %102 = arith.addf %101, %4 : vector<8x128xf32>
    %103 = vector.extract_strided_slice %102 {offsets = [0, 0], sizes = [8, 32], strides = [1, 1]} : vector<8x128xf32> to vector<8x32xf32>
    %104 = vector.extract_strided_slice %102 {offsets = [0, 32], sizes = [8, 32], strides = [1, 1]} : vector<8x128xf32> to vector<8x32xf32>
    %105 = vector.extract_strided_slice %102 {offsets = [0, 64], sizes = [8, 32], strides = [1, 1]} : vector<8x128xf32> to vector<8x32xf32>
    %106 = vector.extract_strided_slice %102 {offsets = [0, 96], sizes = [8, 32], strides = [1, 1]} : vector<8x128xf32> to vector<8x32xf32>
    %107 = arith.mulf %104, %94 : vector<8x32xf32>
    %108 = arith.mulf %103, %105 : vector<8x32xf32>
    %109 = arith.addf %107, %108 : vector<8x32xf32>
    %110 = math.tanh %109 : vector<8x32xf32>
    %111 = arith.mulf %106, %110 : vector<8x32xf32>
    %112 = vector.extract_strided_slice %18 {offsets = [48, 0], sizes = [8, 128], strides = [1, 1]} : vector<64x128xf32> to vector<8x128xf32>
    %cst_23 = arith.constant dense<0.000000e+00> : vector<8x128xf32>
    %113 = tpu.matmul %111, %19, %cst_23 {dimension_numbers = #tpu.dot_dimension_numbers<[1], [0], [0], [1], [0, 0, 1, 1], [], []>} : vector<8x32xf32>, vector<32x128xf32>, vector<8x128xf32> -> vector<8x128xf32>
    %114 = arith.addf %112, %113 : vector<8x128xf32>
    %115 = math.tanh %114 : vector<8x128xf32>
    %116 = arith.mulf %115, %3 : vector<8x128xf32>
    %117 = arith.addf %116, %4 : vector<8x128xf32>
    %118 = vector.extract_strided_slice %117 {offsets = [0, 0], sizes = [8, 32], strides = [1, 1]} : vector<8x128xf32> to vector<8x32xf32>
    %119 = vector.extract_strided_slice %117 {offsets = [0, 32], sizes = [8, 32], strides = [1, 1]} : vector<8x128xf32> to vector<8x32xf32>
    %120 = vector.extract_strided_slice %117 {offsets = [0, 64], sizes = [8, 32], strides = [1, 1]} : vector<8x128xf32> to vector<8x32xf32>
    %121 = vector.extract_strided_slice %117 {offsets = [0, 96], sizes = [8, 32], strides = [1, 1]} : vector<8x128xf32> to vector<8x32xf32>
    %122 = arith.mulf %119, %109 : vector<8x32xf32>
    %123 = arith.mulf %118, %120 : vector<8x32xf32>
    %124 = arith.addf %122, %123 : vector<8x32xf32>
    %125 = math.tanh %124 : vector<8x32xf32>
    %126 = arith.mulf %121, %125 : vector<8x32xf32>
    %127 = vector.extract_strided_slice %18 {offsets = [56, 0], sizes = [8, 128], strides = [1, 1]} : vector<64x128xf32> to vector<8x128xf32>
    %cst_24 = arith.constant dense<0.000000e+00> : vector<8x128xf32>
    %128 = tpu.matmul %126, %19, %cst_24 {dimension_numbers = #tpu.dot_dimension_numbers<[1], [0], [0], [1], [0, 0, 1, 1], [], []>} : vector<8x32xf32>, vector<32x128xf32>, vector<8x128xf32> -> vector<8x128xf32>
    %129 = arith.addf %127, %128 : vector<8x128xf32>
    %130 = math.tanh %129 : vector<8x128xf32>
    %131 = arith.mulf %130, %3 : vector<8x128xf32>
    %132 = arith.addf %131, %4 : vector<8x128xf32>
    %133 = vector.extract_strided_slice %132 {offsets = [0, 0], sizes = [8, 32], strides = [1, 1]} : vector<8x128xf32> to vector<8x32xf32>
    %134 = vector.extract_strided_slice %132 {offsets = [0, 32], sizes = [8, 32], strides = [1, 1]} : vector<8x128xf32> to vector<8x32xf32>
    %135 = vector.extract_strided_slice %132 {offsets = [0, 64], sizes = [8, 32], strides = [1, 1]} : vector<8x128xf32> to vector<8x32xf32>
    %136 = vector.extract_strided_slice %132 {offsets = [0, 96], sizes = [8, 32], strides = [1, 1]} : vector<8x128xf32> to vector<8x32xf32>
    %137 = arith.mulf %134, %124 : vector<8x32xf32>
    %138 = arith.mulf %133, %135 : vector<8x32xf32>
    %139 = arith.addf %137, %138 : vector<8x32xf32>
    %140 = math.tanh %139 : vector<8x32xf32>
    %141 = arith.mulf %136, %140 : vector<8x32xf32>
    %142 = tpu.concatenate %36, %51, %66, %81, %96, %111, %126, %141 in 0 : vector<8x32xf32>, vector<8x32xf32>, vector<8x32xf32>, vector<8x32xf32>, vector<8x32xf32>, vector<8x32xf32>, vector<8x32xf32>, vector<8x32xf32> -> vector<64x32xf32>
    %c56 = arith.constant 56 : index
    %c0_25 = arith.constant 0 : index
    %143 = vector.load %arg1[%c56, %c0_25] : memref<168x128xf32, #tpu.memory_space<vmem>>, vector<32x128xf32>
    %cst_26 = arith.constant dense<0.000000e+00> : vector<64x128xf32>
    %144 = tpu.matmul %142, %143, %cst_26 {dimension_numbers = #tpu.dot_dimension_numbers<[1], [0], [0], [1], [0, 0, 1, 1], [], []>} : vector<64x32xf32>, vector<32x128xf32>, vector<64x128xf32> -> vector<64x128xf32>
    %c120 = arith.constant 120 : index
    %c0_27 = arith.constant 0 : index
    %145 = vector.load %arg1[%c120, %c0_27] : memref<168x128xf32, #tpu.memory_space<vmem>>, vector<1x128xf32>
    %146 = vector.broadcast %145 : vector<1x128xf32> to vector<64x128xf32>
    %147 = arith.addf %144, %146 : vector<64x128xf32>
    %c88 = arith.constant 88 : index
    %c0_28 = arith.constant 0 : index
    %148 = vector.load %arg1[%c88, %c0_28] : memref<168x128xf32, #tpu.memory_space<vmem>>, vector<32x128xf32>
    %cst_29 = arith.constant 0.000000e+00 : f32
    %149 = vector.broadcast %cst_29 : f32 to vector<8x32xf32>
    %cst_30 = arith.constant 0.000000e+00 : f32
    %150 = vector.broadcast %cst_30 : f32 to vector<8x32xf32>
    %151 = vector.extract_strided_slice %147 {offsets = [0, 0], sizes = [8, 128], strides = [1, 1]} : vector<64x128xf32> to vector<8x128xf32>
    %cst_31 = arith.constant dense<0.000000e+00> : vector<8x128xf32>
    %152 = tpu.matmul %149, %148, %cst_31 {dimension_numbers = #tpu.dot_dimension_numbers<[1], [0], [0], [1], [0, 0, 1, 1], [], []>} : vector<8x32xf32>, vector<32x128xf32>, vector<8x128xf32> -> vector<8x128xf32>
    %153 = arith.addf %151, %152 : vector<8x128xf32>
    %154 = math.tanh %153 : vector<8x128xf32>
    %155 = arith.mulf %154, %3 : vector<8x128xf32>
    %156 = arith.addf %155, %4 : vector<8x128xf32>
    %157 = vector.extract_strided_slice %156 {offsets = [0, 0], sizes = [8, 32], strides = [1, 1]} : vector<8x128xf32> to vector<8x32xf32>
    %158 = vector.extract_strided_slice %156 {offsets = [0, 32], sizes = [8, 32], strides = [1, 1]} : vector<8x128xf32> to vector<8x32xf32>
    %159 = vector.extract_strided_slice %156 {offsets = [0, 64], sizes = [8, 32], strides = [1, 1]} : vector<8x128xf32> to vector<8x32xf32>
    %160 = vector.extract_strided_slice %156 {offsets = [0, 96], sizes = [8, 32], strides = [1, 1]} : vector<8x128xf32> to vector<8x32xf32>
    %161 = arith.mulf %158, %150 : vector<8x32xf32>
    %162 = arith.mulf %157, %159 : vector<8x32xf32>
    %163 = arith.addf %161, %162 : vector<8x32xf32>
    %164 = math.tanh %163 : vector<8x32xf32>
    %165 = arith.mulf %160, %164 : vector<8x32xf32>
    %166 = vector.extract_strided_slice %147 {offsets = [8, 0], sizes = [8, 128], strides = [1, 1]} : vector<64x128xf32> to vector<8x128xf32>
    %cst_32 = arith.constant dense<0.000000e+00> : vector<8x128xf32>
    %167 = tpu.matmul %165, %148, %cst_32 {dimension_numbers = #tpu.dot_dimension_numbers<[1], [0], [0], [1], [0, 0, 1, 1], [], []>} : vector<8x32xf32>, vector<32x128xf32>, vector<8x128xf32> -> vector<8x128xf32>
    %168 = arith.addf %166, %167 : vector<8x128xf32>
    %169 = math.tanh %168 : vector<8x128xf32>
    %170 = arith.mulf %169, %3 : vector<8x128xf32>
    %171 = arith.addf %170, %4 : vector<8x128xf32>
    %172 = vector.extract_strided_slice %171 {offsets = [0, 0], sizes = [8, 32], strides = [1, 1]} : vector<8x128xf32> to vector<8x32xf32>
    %173 = vector.extract_strided_slice %171 {offsets = [0, 32], sizes = [8, 32], strides = [1, 1]} : vector<8x128xf32> to vector<8x32xf32>
    %174 = vector.extract_strided_slice %171 {offsets = [0, 64], sizes = [8, 32], strides = [1, 1]} : vector<8x128xf32> to vector<8x32xf32>
    %175 = vector.extract_strided_slice %171 {offsets = [0, 96], sizes = [8, 32], strides = [1, 1]} : vector<8x128xf32> to vector<8x32xf32>
    %176 = arith.mulf %173, %163 : vector<8x32xf32>
    %177 = arith.mulf %172, %174 : vector<8x32xf32>
    %178 = arith.addf %176, %177 : vector<8x32xf32>
    %179 = math.tanh %178 : vector<8x32xf32>
    %180 = arith.mulf %175, %179 : vector<8x32xf32>
    %181 = vector.extract_strided_slice %147 {offsets = [16, 0], sizes = [8, 128], strides = [1, 1]} : vector<64x128xf32> to vector<8x128xf32>
    %cst_33 = arith.constant dense<0.000000e+00> : vector<8x128xf32>
    %182 = tpu.matmul %180, %148, %cst_33 {dimension_numbers = #tpu.dot_dimension_numbers<[1], [0], [0], [1], [0, 0, 1, 1], [], []>} : vector<8x32xf32>, vector<32x128xf32>, vector<8x128xf32> -> vector<8x128xf32>
    %183 = arith.addf %181, %182 : vector<8x128xf32>
    %184 = math.tanh %183 : vector<8x128xf32>
    %185 = arith.mulf %184, %3 : vector<8x128xf32>
    %186 = arith.addf %185, %4 : vector<8x128xf32>
    %187 = vector.extract_strided_slice %186 {offsets = [0, 0], sizes = [8, 32], strides = [1, 1]} : vector<8x128xf32> to vector<8x32xf32>
    %188 = vector.extract_strided_slice %186 {offsets = [0, 32], sizes = [8, 32], strides = [1, 1]} : vector<8x128xf32> to vector<8x32xf32>
    %189 = vector.extract_strided_slice %186 {offsets = [0, 64], sizes = [8, 32], strides = [1, 1]} : vector<8x128xf32> to vector<8x32xf32>
    %190 = vector.extract_strided_slice %186 {offsets = [0, 96], sizes = [8, 32], strides = [1, 1]} : vector<8x128xf32> to vector<8x32xf32>
    %191 = arith.mulf %188, %178 : vector<8x32xf32>
    %192 = arith.mulf %187, %189 : vector<8x32xf32>
    %193 = arith.addf %191, %192 : vector<8x32xf32>
    %194 = math.tanh %193 : vector<8x32xf32>
    %195 = arith.mulf %190, %194 : vector<8x32xf32>
    %196 = vector.extract_strided_slice %147 {offsets = [24, 0], sizes = [8, 128], strides = [1, 1]} : vector<64x128xf32> to vector<8x128xf32>
    %cst_34 = arith.constant dense<0.000000e+00> : vector<8x128xf32>
    %197 = tpu.matmul %195, %148, %cst_34 {dimension_numbers = #tpu.dot_dimension_numbers<[1], [0], [0], [1], [0, 0, 1, 1], [], []>} : vector<8x32xf32>, vector<32x128xf32>, vector<8x128xf32> -> vector<8x128xf32>
    %198 = arith.addf %196, %197 : vector<8x128xf32>
    %199 = math.tanh %198 : vector<8x128xf32>
    %200 = arith.mulf %199, %3 : vector<8x128xf32>
    %201 = arith.addf %200, %4 : vector<8x128xf32>
    %202 = vector.extract_strided_slice %201 {offsets = [0, 0], sizes = [8, 32], strides = [1, 1]} : vector<8x128xf32> to vector<8x32xf32>
    %203 = vector.extract_strided_slice %201 {offsets = [0, 32], sizes = [8, 32], strides = [1, 1]} : vector<8x128xf32> to vector<8x32xf32>
    %204 = vector.extract_strided_slice %201 {offsets = [0, 64], sizes = [8, 32], strides = [1, 1]} : vector<8x128xf32> to vector<8x32xf32>
    %205 = vector.extract_strided_slice %201 {offsets = [0, 96], sizes = [8, 32], strides = [1, 1]} : vector<8x128xf32> to vector<8x32xf32>
    %206 = arith.mulf %203, %193 : vector<8x32xf32>
    %207 = arith.mulf %202, %204 : vector<8x32xf32>
    %208 = arith.addf %206, %207 : vector<8x32xf32>
    %209 = math.tanh %208 : vector<8x32xf32>
    %210 = arith.mulf %205, %209 : vector<8x32xf32>
    %211 = vector.extract_strided_slice %147 {offsets = [32, 0], sizes = [8, 128], strides = [1, 1]} : vector<64x128xf32> to vector<8x128xf32>
    %cst_35 = arith.constant dense<0.000000e+00> : vector<8x128xf32>
    %212 = tpu.matmul %210, %148, %cst_35 {dimension_numbers = #tpu.dot_dimension_numbers<[1], [0], [0], [1], [0, 0, 1, 1], [], []>} : vector<8x32xf32>, vector<32x128xf32>, vector<8x128xf32> -> vector<8x128xf32>
    %213 = arith.addf %211, %212 : vector<8x128xf32>
    %214 = math.tanh %213 : vector<8x128xf32>
    %215 = arith.mulf %214, %3 : vector<8x128xf32>
    %216 = arith.addf %215, %4 : vector<8x128xf32>
    %217 = vector.extract_strided_slice %216 {offsets = [0, 0], sizes = [8, 32], strides = [1, 1]} : vector<8x128xf32> to vector<8x32xf32>
    %218 = vector.extract_strided_slice %216 {offsets = [0, 32], sizes = [8, 32], strides = [1, 1]} : vector<8x128xf32> to vector<8x32xf32>
    %219 = vector.extract_strided_slice %216 {offsets = [0, 64], sizes = [8, 32], strides = [1, 1]} : vector<8x128xf32> to vector<8x32xf32>
    %220 = vector.extract_strided_slice %216 {offsets = [0, 96], sizes = [8, 32], strides = [1, 1]} : vector<8x128xf32> to vector<8x32xf32>
    %221 = arith.mulf %218, %208 : vector<8x32xf32>
    %222 = arith.mulf %217, %219 : vector<8x32xf32>
    %223 = arith.addf %221, %222 : vector<8x32xf32>
    %224 = math.tanh %223 : vector<8x32xf32>
    %225 = arith.mulf %220, %224 : vector<8x32xf32>
    %226 = vector.extract_strided_slice %147 {offsets = [40, 0], sizes = [8, 128], strides = [1, 1]} : vector<64x128xf32> to vector<8x128xf32>
    %cst_36 = arith.constant dense<0.000000e+00> : vector<8x128xf32>
    %227 = tpu.matmul %225, %148, %cst_36 {dimension_numbers = #tpu.dot_dimension_numbers<[1], [0], [0], [1], [0, 0, 1, 1], [], []>} : vector<8x32xf32>, vector<32x128xf32>, vector<8x128xf32> -> vector<8x128xf32>
    %228 = arith.addf %226, %227 : vector<8x128xf32>
    %229 = math.tanh %228 : vector<8x128xf32>
    %230 = arith.mulf %229, %3 : vector<8x128xf32>
    %231 = arith.addf %230, %4 : vector<8x128xf32>
    %232 = vector.extract_strided_slice %231 {offsets = [0, 0], sizes = [8, 32], strides = [1, 1]} : vector<8x128xf32> to vector<8x32xf32>
    %233 = vector.extract_strided_slice %231 {offsets = [0, 32], sizes = [8, 32], strides = [1, 1]} : vector<8x128xf32> to vector<8x32xf32>
    %234 = vector.extract_strided_slice %231 {offsets = [0, 64], sizes = [8, 32], strides = [1, 1]} : vector<8x128xf32> to vector<8x32xf32>
    %235 = vector.extract_strided_slice %231 {offsets = [0, 96], sizes = [8, 32], strides = [1, 1]} : vector<8x128xf32> to vector<8x32xf32>
    %236 = arith.mulf %233, %223 : vector<8x32xf32>
    %237 = arith.mulf %232, %234 : vector<8x32xf32>
    %238 = arith.addf %236, %237 : vector<8x32xf32>
    %239 = math.tanh %238 : vector<8x32xf32>
    %240 = arith.mulf %235, %239 : vector<8x32xf32>
    %241 = vector.extract_strided_slice %147 {offsets = [48, 0], sizes = [8, 128], strides = [1, 1]} : vector<64x128xf32> to vector<8x128xf32>
    %cst_37 = arith.constant dense<0.000000e+00> : vector<8x128xf32>
    %242 = tpu.matmul %240, %148, %cst_37 {dimension_numbers = #tpu.dot_dimension_numbers<[1], [0], [0], [1], [0, 0, 1, 1], [], []>} : vector<8x32xf32>, vector<32x128xf32>, vector<8x128xf32> -> vector<8x128xf32>
    %243 = arith.addf %241, %242 : vector<8x128xf32>
    %244 = math.tanh %243 : vector<8x128xf32>
    %245 = arith.mulf %244, %3 : vector<8x128xf32>
    %246 = arith.addf %245, %4 : vector<8x128xf32>
    %247 = vector.extract_strided_slice %246 {offsets = [0, 0], sizes = [8, 32], strides = [1, 1]} : vector<8x128xf32> to vector<8x32xf32>
    %248 = vector.extract_strided_slice %246 {offsets = [0, 32], sizes = [8, 32], strides = [1, 1]} : vector<8x128xf32> to vector<8x32xf32>
    %249 = vector.extract_strided_slice %246 {offsets = [0, 64], sizes = [8, 32], strides = [1, 1]} : vector<8x128xf32> to vector<8x32xf32>
    %250 = vector.extract_strided_slice %246 {offsets = [0, 96], sizes = [8, 32], strides = [1, 1]} : vector<8x128xf32> to vector<8x32xf32>
    %251 = arith.mulf %248, %238 : vector<8x32xf32>
    %252 = arith.mulf %247, %249 : vector<8x32xf32>
    %253 = arith.addf %251, %252 : vector<8x32xf32>
    %254 = math.tanh %253 : vector<8x32xf32>
    %255 = arith.mulf %250, %254 : vector<8x32xf32>
    %256 = vector.extract_strided_slice %147 {offsets = [56, 0], sizes = [8, 128], strides = [1, 1]} : vector<64x128xf32> to vector<8x128xf32>
    %cst_38 = arith.constant dense<0.000000e+00> : vector<8x128xf32>
    %257 = tpu.matmul %255, %148, %cst_38 {dimension_numbers = #tpu.dot_dimension_numbers<[1], [0], [0], [1], [0, 0, 1, 1], [], []>} : vector<8x32xf32>, vector<32x128xf32>, vector<8x128xf32> -> vector<8x128xf32>
    %258 = arith.addf %256, %257 : vector<8x128xf32>
    %259 = math.tanh %258 : vector<8x128xf32>
    %260 = arith.mulf %259, %3 : vector<8x128xf32>
    %261 = arith.addf %260, %4 : vector<8x128xf32>
    %262 = vector.extract_strided_slice %261 {offsets = [0, 0], sizes = [8, 32], strides = [1, 1]} : vector<8x128xf32> to vector<8x32xf32>
    %263 = vector.extract_strided_slice %261 {offsets = [0, 32], sizes = [8, 32], strides = [1, 1]} : vector<8x128xf32> to vector<8x32xf32>
    %264 = vector.extract_strided_slice %261 {offsets = [0, 64], sizes = [8, 32], strides = [1, 1]} : vector<8x128xf32> to vector<8x32xf32>
    %265 = vector.extract_strided_slice %261 {offsets = [0, 96], sizes = [8, 32], strides = [1, 1]} : vector<8x128xf32> to vector<8x32xf32>
    %266 = arith.mulf %263, %253 : vector<8x32xf32>
    %267 = arith.mulf %262, %264 : vector<8x32xf32>
    %268 = arith.addf %266, %267 : vector<8x32xf32>
    %269 = math.tanh %268 : vector<8x32xf32>
    %270 = arith.mulf %265, %269 : vector<8x32xf32>
    %c128 = arith.constant 128 : index
    %c0_39 = arith.constant 0 : index
    %271 = vector.load %arg1[%c128, %c0_39] : memref<168x128xf32, #tpu.memory_space<vmem>>, vector<32x128xf32>
    %cst_40 = arith.constant dense<0.000000e+00> : vector<8x128xf32>
    %272 = tpu.matmul %270, %271, %cst_40 {dimension_numbers = #tpu.dot_dimension_numbers<[1], [0], [0], [1], [0, 0, 1, 1], [], []>} : vector<8x32xf32>, vector<32x128xf32>, vector<8x128xf32> -> vector<8x128xf32>
    %c160 = arith.constant 160 : index
    %c0_41 = arith.constant 0 : index
    %273 = vector.load %arg1[%c160, %c0_41] : memref<168x128xf32, #tpu.memory_space<vmem>>, vector<1x128xf32>
    %274 = vector.broadcast %273 : vector<1x128xf32> to vector<8x128xf32>
    %275 = arith.addf %272, %274 : vector<8x128xf32>
    %276 = arith.mulf %275, %275 : vector<8x128xf32>
    %cst_42 = arith.constant dense<0.000000e+00> : vector<8xf32>
    %277 = vector.multi_reduction <add>, %276, %cst_42 [1] : vector<8x128xf32> to vector<8xf32>
    %278 = vector.shape_cast %277 : vector<8xf32> to vector<8x1xf32>
    %279 = math.rsqrt %278 : vector<8x1xf32>
    %280 = vector.broadcast %279 : vector<8x1xf32> to vector<8x128xf32>
    %281 = arith.mulf %275, %280 : vector<8x128xf32>
    %cst_43 = arith.constant dense<0.000000e+00> : vector<128xf32>
    %282 = vector.multi_reduction <add>, %281, %cst_43 [0] : vector<8x128xf32> to vector<128xf32>
    %283 = vector.shape_cast %282 : vector<128xf32> to vector<1x128xf32>
    %cst_44 = arith.constant 1.250000e-01 : f32
    %284 = vector.broadcast %cst_44 : f32 to vector<1x128xf32>
    %285 = arith.mulf %283, %284 : vector<1x128xf32>
    %c0_45 = arith.constant 0 : index
    %c0_46 = arith.constant 0 : index
    %286 = vector.load %arg2[%c0_45, %c0_46] : memref<1x128xf32, #tpu.memory_space<vmem>>, vector<1x128xf32>
    tpu.vector_store %arg2[%c0_45, %c0_46], %285 {strides = array<i32>} : memref<1x128xf32, #tpu.memory_space<vmem>>, vector<1x128xf32>,
    return
  }
}

</mosaic_0001>

<bundles_post_ra>
// kernel: tpu_custom_call.1
= control target key start
LH: loop header
LB: loop body
LE: loop exit
PB: predicated region body
PF: predicated region fallthrough
CT: control target
= control target key end

     0   :  { %7 = vsyncpa [#allocation3], 0  ;;  %s1443_s0 = inlined_call_operand.vmem [shape: f32[36,16], index: 0, kind: input, shape index: {}]   ;;  %s1444_s1 = inlined_call_operand.hbm [shape: f32[168,128], index: 1, kind: input, shape index: {}]   ;;  %s1445_s2 = inlined_call_operand.hbm [shape: f32[1,128], index: 2, kind: output, shape index: {}]  }
   0x1   :  { %8 = vsyncpa [#allocation4], 0  ;;  %s15_s11 = sshll.u32 %s1444_s1, 4  ;;  %s1146_s12 = smov [#allocation2]   ;;  %s16_s11 = int_to_ptr.hbm [resolvable:$true] %s15_s11 }
   0x2   :  { %s17_s13 = sshll.u32 %s1146_s12, 4  ;;  %s1147_s14 = smov 128   ;;  %s18_s13 = int_to_ptr.vmem [resolvable:$true] %s17_s13 }
   0x3   :  { %s1148_s15 = smov 8  }
   0x4   :  { %23 = dma.hbm_to_vmem [thread:$0]  %s16_s11, 2688, %s18_s13, [#allocation3], %s1147_s14, %s1147_s14, %s1148_s15  }
   0x5   :  { %1142 = dma.done.wait [#allocation3], 2688  }
   0x6   :  { %1143 = vsyncadd [#allocation3], 4294964608  ;;  %v1172_v0 = vld [vmem:[#allocation2 + $0x28] sm:$0xff]  ;;  %v1174_v2 = vld [vmem:[#allocation2 + $0x20] sm:$0xff]  ;;  %vm53_vm0 = vcmask 130048   ;;  %v1149_v7 = vmov 0.0  }
   0x7   :  { %v50_v1 = vld [vmem:[#allocation2 + $0x8] sm:$0xff]  ;;  %139 = vmatpush.msra.mxu1 %v1172_v0  ;;  %v49_v3 = vld [vmem:[#allocation2] sm:$0xff]  ;;  %v1180_v5 = vld [vmem:[#allocation2 + $0x18] sm:$0xff]  ;;  %185 = vmatpush.msra.mxu2 %v1172_v0  ;;  %vm28_vm1 = vcmask 523264   ;;  %v1150_v13 = vmov 1.0   ;;  %vm30_vm2 = vcmask 785408  }
   0x8   :  { %92 = vmatpush.msra.mxu0 %v50_v1  ;;  %v34_v4 = vld [vmem:[%s1443_s0] ss:$4 sm:$0xff]  ;;  %v29_v14 = vsel %vm28_vm1, 0.5, %v1150_v13  ;;  %v32_v15 = vsel %vm28_vm1, 0.5, %v1149_v7  ;;  %s1151_s17 = smov 64   ;;  %s1152_s18 = smov 32  }
   0x9   :  { %140 = vmatpush.msra.mxu1 %v1174_v2  ;;  %v1185_v6 = vld [vmem:[#allocation2 + $0x10] sm:$0xff]  ;;  %186 = vmatpush.msra.mxu2 %v1174_v2  ;;  %v1213_v16 = vsel %vm30_vm2, %v29_v14, 0.5  ;;  %v1215_v18 = vsel %vm30_vm2, %v32_v15, 0.5  ;;  %v492_v28 = vld [vmem:[#allocation2 + $0x48] sm:$0xff]  ;;  %v491_v29 = vld [vmem:[#allocation2 + $0x40] sm:$0xff]  ;;  %vm123_vm3 = vcmask 261120  }
   0xa   :  { %93 = vmatpush.msra.mxu0 %v49_v3  ;;  %v1209_v8 = vld [vmem:[#allocation2 + $0x30] ss:$0 sm:$0xff]  ;;  %v490_v30 = vld [vmem:[#allocation2 + $0x38] sm:$0xff]  ;;  %s969_s8 = sshll.u32 %s1445_s2, 4  ;;  %s970_s8 = int_to_ptr.hbm [resolvable:$true] %s969_s8 }
   0xb   :  { %986 = vmatmul.msk.f32.vlgmr.msra.gmra.mxu0 %vm53_vm0, %v34_v4  ;;  %141 = vmatpush.msra.mxu1 %v1180_v5  ;;  %v493_v27 = vld [vmem:[#allocation2 + $0x50] sm:$0xff] }
   0xc   :  { %369 = vmatpush.msrb.mxu0 %v1172_v0  ;;  %187 = vmatpush.msra.mxu2 %v1180_v5  ;;  %v979_v33 = vld [vmem:[%s1443_s0 + $0x1] ss:$4 sm:$0xff]  ;;  %v980_v50 = vld [vmem:[%s1443_s0 + $0x2] ss:$4 sm:$0xff]  ;;  %v981_v1 = vld [vmem:[%s1443_s0 + $0x3] ss:$4 sm:$0xff] }
   0xd   :  { %142 = vmatpush.msra.mxu1 %v1185_v6  ;;  %513 = vmatpush.msra.mxu3 %v493_v27 }
   0xe   :  { %370 = vmatpush.msrb.mxu0 %v1174_v2  ;;  %143 = vmatmul.f32.vlgmr.msra.gmra.mxu1 %v1149_v7 }
   0xf   :  { %188 = vmatpush.msra.mxu2 %v1185_v6  ;;  %277 = vmatpush.msrb.mxu1 %v1172_v0 }
  0x10   :  { %371 = vmatpush.msrb.mxu0 %v1180_v5  ;;  %514 = vmatpush.msra.mxu3 %v492_v28 }
  0x11   :  { %231 = vmatpush.msrb.mxu2 %v1172_v0  ;;  %278 = vmatpush.msrb.mxu1 %v1174_v2 }
  0x12   :  { %372 = vmatpush.msrb.mxu0 %v1185_v6  ;;  %515 = vmatpush.msra.mxu3 %v491_v29 }
  0x13   :  { %232 = vmatpush.msrb.mxu2 %v1174_v2  ;;  %279 = vmatpush.msrb.mxu1 %v1180_v5 }
  0x14   :  { %516 = vmatpush.msra.mxu3 %v490_v30  ;;  %987 = vmatmul.msk.f32.gmra.mxu0 %vm53_vm0, %v979_v33 }
  0x15   :  { %233 = vmatpush.msrb.mxu2 %v1180_v5  ;;  %280 = vmatpush.msrb.mxu1 %v1185_v6 }
  0x17   :  { %234 = vmatpush.msrb.mxu2 %v1185_v6  ;;  %415 = vmatpush.msra.mxu1 %v1172_v0 }
  0x19   :  { %416 = vmatpush.msra.mxu1 %v1174_v2 }
  0x1b   :  { %417 = vmatpush.msra.mxu1 %v1180_v5 }
  0x1c   :  { %988 = vmatmul.msk.f32.gmra.mxu0 %vm53_vm0, %v980_v50 }
  0x1d   :  { %418 = vmatpush.msra.mxu1 %v1185_v6 }
  0x24   :  { %989 = vmatmul.msk.f32.gmra.mxu0 %vm53_vm0, %v981_v1  ;;  %v1316_v1 = vld [vmem:[#allocation2 + $0x58] sm:$0xff] }
  0x88   :  { %v95_v9 = vpop.f32.mrf.mxu0 }
  0x89   :  { %v96_v10 = vadd.f32 %v1209_v8, %v95_v9 }
  0x8b   :  { %v144_v11 = vpop.f32.mrf.mxu1 }
  0x8c   :  { %v147_v12 = vadd.f32 %v144_v11, %v96_v10 }
  0x8e   :  { %1028 = vtanh.f32 %v147_v12 }
  0x91   :  { %v98_v35 = vpop.f32.mrf.mxu0 }
  0x92   :  { %v99_v36 = vadd.f32 %v1209_v8, %v98_v35 }
  0x94   :  { %v1029_v17 = vpop.eup %1028 }
  0x95   :  { %v149_v19 = vmul.f32 %v1029_v17, %v1213_v16 }
  0x97   :  { %v150_v20 = vadd.f32 %v149_v19, %v1215_v18 }
  0x99   :  { %153 = vrot.lane.b32.xlu0 %v150_v20, %s1151_s17  ;;  %v151_v23 = vmul.f32 0.0, %v150_v20  ;;  %v101_v52 = vpop.f32.mrf.mxu0 }
  0x9a   :  { %v102_v53 = vadd.f32 %v1209_v8, %v101_v52 }
 0x10b   :  { %v154_v21 = vpop.permute.xlu0 %153 }
 0x10c   :  { %v156_v22 = vmul.f32 %v154_v21, %v150_v20 }
 0x10e   :  { %158 = vrot.lane.b32.xlu0 %v156_v22, %s1152_s18 }
 0x180   :  { %v159_v24 = vpop.permute.xlu0 %158 }
 0x181   :  { %v161_v25 = vadd.f32 %v159_v24, %v151_v23  ;;  %v982_v24 = vld [vmem:[%s1443_s0 + $0x4] ss:$4 sm:$0xff] }
 0x182   :  { %990 = vmatmul.msk.f32.gmra.mxu0 %vm53_vm0, %v982_v24 }
 0x183   :  { %1030 = vtanh.f32 %v161_v25 }
 0x189   :  { %v1031_v26 = vpop.eup %1030 }
 0x18a   :  { %164 = vrot.lane.b32.xlu1 %v1031_v26, %s1151_s17 }
 0x1fc   :  { %v165_v31 = vpop.permute.xlu1 %164 }
 0x1fd   :  { %v167_v32 = vmul.f32 %v165_v31, %v150_v20 }
 0x1ff   :  { %169 = vrot.lane.b32.xlu1 %v167_v32, %s1152_s18 }
 0x271   :  { %v170_v34 = vpop.permute.xlu1 %169 }
 0x272   :  { %994 = vmatmul.msk.f32.vlgmr.msra.gmra.mxu2 %vm123_vm3, %v170_v34  ;;  %1001 = vmatmul.msk.f32.vlgmr.msra.gmra.mxu3 %vm123_vm3, %v170_v34 }
 0x273   :  { %323 = vmatpush.msra.mxu2 %v1172_v0 }
 0x275   :  { %324 = vmatpush.msra.mxu2 %v1174_v2 }
 0x277   :  { %325 = vmatpush.msra.mxu2 %v1180_v5 }
 0x279   :  { %326 = vmatpush.msra.mxu2 %v1185_v6 }
 0x2f5   :  { %v190_v37 = vpop.f32.mrf.mxu2 }
 0x2f6   :  { %v193_v38 = vadd.f32 %v190_v37, %v99_v36 }
 0x2f8   :  { %1032 = vtanh.f32 %v193_v38 }
 0x2fe   :  { %v1033_v39 = vpop.eup %1032 }
 0x2ff   :  { %v195_v40 = vmul.f32 %v1033_v39, %v1213_v16  ;;  %v983_v39 = vld [vmem:[%s1443_s0 + $0x5] ss:$4 sm:$0xff] }
 0x300   :  { %991 = vmatmul.msk.f32.gmra.mxu0 %vm53_vm0, %v983_v39 }
 0x301   :  { %v196_v41 = vadd.f32 %v195_v40, %v1215_v18  ;;  %v984_v40 = vld [vmem:[%s1443_s0 + $0x6] ss:$4 sm:$0xff] }
 0x303   :  { %199 = vrot.lane.b32.xlu2 %v196_v41, %s1151_s17  ;;  %v197_v44 = vmul.f32 %v196_v41, %v161_v25 }
 0x308   :  { %992 = vmatmul.msk.f32.gmra.mxu0 %vm53_vm0, %v984_v40 }
 0x35d   :  { %v200_v42 = vpop.permute.xlu2 %199 }
 0x35e   :  { %v202_v43 = vmul.f32 %v200_v42, %v196_v41 }
 0x360   :  { %204 = vrot.lane.b32.xlu2 %v202_v43, %s1152_s18 }
 0x3ba   :  { %v205_v45 = vpop.permute.xlu2 %204 }
 0x3bb   :  { %v207_v46 = vadd.f32 %v205_v45, %v197_v44 }
 0x3bd   :  { %1034 = vtanh.f32 %v207_v46 }
 0x3c3   :  { %v1035_v47 = vpop.eup %1034 }
 0x3c4   :  { %210 = vrot.lane.b32.xlu0 %v1035_v47, %s1151_s17 }
 0x436   :  { %v211_v48 = vpop.permute.xlu0 %210 }
 0x437   :  { %v213_v49 = vmul.f32 %v211_v48, %v196_v41  ;;  %v985_v41 = vld [vmem:[%s1443_s0 + $0x7] ss:$4 sm:$0xff]  ;;  %s1153_s0 = smov [#allocation5]  }
 0x438   :  { %993 = vmatmul.msk.f32.gmra.mxu0 %vm53_vm0, %v985_v41  ;;  %s967_s5 = sshll.u32 %s1153_s0, 4  ;;  %s968_s5 = int_to_ptr.vmem [resolvable:$true] %s967_s5 }
 0x439   :  { %215 = vrot.lane.b32.xlu1 %v213_v49, %s1152_s18 }
 0x4ab   :  { %v216_v51 = vpop.permute.xlu1 %215 }
 0x4ac   :  { %995 = vmatmul.msk.f32.vlgmr.msrb.gmra.mxu2 %vm123_vm3, %v216_v51  ;;  %1002 = vmatmul.msk.f32.gmra.mxu3 %vm123_vm3, %v216_v51 }
 0x4ad   :  { %461 = vmatpush.msrb.mxu2 %v1172_v0 }
 0x4af   :  { %462 = vmatpush.msrb.mxu2 %v1174_v2 }
 0x4b1   :  { %463 = vmatpush.msrb.mxu2 %v1180_v5  ;;  %v104_v5 = vpop.f32.mrf.mxu0 }
 0x4b3   :  { %464 = vmatpush.msrb.mxu2 %v1185_v6  ;;  %v105_v6 = vadd.f32 %v1209_v8, %v104_v5 }
 0x4b9   :  { %v107_v26 = vpop.f32.mrf.mxu0 }
 0x4ba   :  { %v108_v27 = vadd.f32 %v1209_v8, %v107_v26 }
 0x4c1   :  { %v110_v45 = vpop.f32.mrf.mxu0 }
 0x4c2   :  { %v111_v48 = vadd.f32 %v1209_v8, %v110_v45 }
 0x52f   :  { %v236_v54 = vpop.f32.mrf.mxu2 }
 0x530   :  { %v239_v55 = vadd.f32 %v236_v54, %v102_v53 }
 0x532   :  { %1036 = vtanh.f32 %v239_v55 }
 0x538   :  { %v1037_v56 = vpop.eup %1036 }
 0x539   :  { %v241_v57 = vmul.f32 %v1037_v56, %v1213_v16 }
 0x53b   :  { %v242_v58 = vadd.f32 %v241_v57, %v1215_v18 }
 0x53d   :  { %245 = vrot.lane.b32.xlu2 %v242_v58, %s1151_s17  ;;  %v243_v61 = vmul.f32 %v242_v58, %v207_v46  ;;  %v113_v46 = vpop.f32.mrf.mxu0 }
 0x545   :  { %v1297_v47 = vpop.f32.mrf.mxu0 }
 0x597   :  { %v246_v59 = vpop.permute.xlu2 %245 }
 0x598   :  { %v248_v60 = vmul.f32 %v246_v59, %v242_v58 }
 0x59a   :  { %250 = vrot.lane.b32.xlu0 %v248_v60, %s1152_s18 }
 0x60c   :  { %v251_v62 = vpop.permute.xlu0 %250 }
 0x60d   :  { %v253_v63 = vadd.f32 %v251_v62, %v243_v61  ;;  %v1306_v62 = vld [vmem:[#allocation2 + $0x70] sm:$0xff] }
 0x60f   :  { %1038 = vtanh.f32 %v253_v63 }
 0x615   :  { %v1039_v0 = vpop.eup %1038 }
 0x616   :  { %256 = vrot.lane.b32.xlu1 %v1039_v0, %s1151_s17  ;;  %v1312_v0 = vld [vmem:[#allocation2 + $0x60] sm:$0xff] }
 0x688   :  { %v257_v2 = vpop.permute.xlu1 %256 }
 0x689   :  { %v259_v3 = vmul.f32 %v257_v2, %v242_v58 }
 0x68b   :  { %261 = vrot.lane.b32.xlu2 %v259_v3, %s1152_s18  ;;  %v114_v3 = vadd.f32 %v1209_v8, %v113_v46 }
 0x6e5   :  { %v262_v4 = vpop.permute.xlu2 %261 }
 0x6e6   :  { %996 = vmatmul.msk.f32.vlgmr.msrb.gmra.mxu1 %vm123_vm3, %v262_v4  ;;  %1003 = vmatmul.msk.f32.gmra.mxu3 %vm123_vm3, %v262_v4 }
 0x6e7   :  { %558 = vmatpush.msrb.mxu1 %v1306_v62 }
 0x763   :  { %v282_v9 = vpop.f32.mrf.mxu1 }
 0x764   :  { %v285_v10 = vadd.f32 %v282_v9, %v105_v6  ;;  %v1334_v6 = vld [vmem:[#allocation2 + $0x78] ss:$0 sm:$0xff]  ;;  %v518_v9 = vpop.f32.mrf.mxu3 }
 0x766   :  { %1040 = vtanh.f32 %v285_v10  ;;  %v519_v10 = vadd.f32 %v1334_v6, %v518_v9 }
 0x76c   :  { %v1041_v11 = vpop.eup %1040  ;;  %v521_v39 = vpop.f32.mrf.mxu3 }
 0x76d   :  { %v287_v12 = vmul.f32 %v1041_v11, %v1213_v16  ;;  %v522_v40 = vadd.f32 %v1334_v6, %v521_v39 }
 0x76f   :  { %v288_v13 = vadd.f32 %v287_v12, %v1215_v18 }
 0x771   :  { %291 = vrot.lane.b32.xlu0 %v288_v13, %s1151_s17  ;;  %v289_v17 = vmul.f32 %v288_v13, %v253_v63  ;;  %v1308_v63 = vld [vmem:[#allocation2 + $0x68] sm:$0xff] }
 0x772   :  { %559 = vmatpush.msrb.mxu1 %v1308_v63 }
 0x774   :  { %560 = vmatpush.msrb.mxu1 %v1312_v0 }
 0x776   :  { %561 = vmatpush.msrb.mxu1 %v1316_v1 }
 0x7e3   :  { %v292_v14 = vpop.permute.xlu0 %291 }
 0x7e4   :  { %v294_v15 = vmul.f32 %v292_v14, %v288_v13 }
 0x7e6   :  { %296 = vrot.lane.b32.xlu1 %v294_v15, %s1152_s18 }
 0x858   :  { %v297_v19 = vpop.permute.xlu1 %296 }
 0x859   :  { %v299_v20 = vadd.f32 %v297_v19, %v289_v17 }
 0x85b   :  { %1042 = vtanh.f32 %v299_v20 }
 0x861   :  { %v1043_v21 = vpop.eup %1042 }
 0x862   :  { %302 = vrot.lane.b32.xlu2 %v1043_v21, %s1151_s17 }
 0x8bc   :  { %v303_v22 = vpop.permute.xlu2 %302 }
 0x8bd   :  { %v305_v23 = vmul.f32 %v303_v22, %v288_v13 }
 0x8bf   :  { %307 = vrot.lane.b32.xlu0 %v305_v23, %s1152_s18 }
 0x931   :  { %v308_v25 = vpop.permute.xlu0 %307 }
 0x932   :  { %997 = vmatmul.msk.f32.vlgmr.msra.gmra.mxu2 %vm123_vm3, %v308_v25  ;;  %1004 = vmatmul.msk.f32.gmra.mxu3 %vm123_vm3, %v308_v25 }
 0x933   :  { %604 = vmatpush.msra.mxu2 %v1306_v62 }
 0x935   :  { %605 = vmatpush.msra.mxu2 %v1308_v63 }
 0x937   :  { %606 = vmatpush.msra.mxu2 %v1312_v0 }
 0x939   :  { %607 = vmatpush.msra.mxu2 %v1316_v1 }
 0x9b5   :  { %v328_v28 = vpop.f32.mrf.mxu2 }
 0x9b6   :  { %v331_v29 = vadd.f32 %v328_v28, %v108_v27 }
 0x9b8   :  { %1044 = vtanh.f32 %v331_v29 }
 0x9be   :  { %v1045_v30 = vpop.eup %1044 }
 0x9bf   :  { %v333_v31 = vmul.f32 %v1045_v30, %v1213_v16 }
 0x9c1   :  { %v334_v32 = vadd.f32 %v333_v31, %v1215_v18 }
 0x9c3   :  { %337 = vrot.lane.b32.xlu1 %v334_v32, %s1151_s17  ;;  %v335_v35 = vmul.f32 %v334_v32, %v299_v20 }
 0xa35   :  { %v338_v33 = vpop.permute.xlu1 %337 }
 0xa36   :  { %v340_v34 = vmul.f32 %v338_v33, %v334_v32 }
 0xa38   :  { %342 = vrot.lane.b32.xlu2 %v340_v34, %s1152_s18 }
 0xa92   :  { %v343_v36 = vpop.permute.xlu2 %342 }
 0xa93   :  { %v345_v37 = vadd.f32 %v343_v36, %v335_v35 }
 0xa95   :  { %1046 = vtanh.f32 %v345_v37 }
 0xa9b   :  { %v1047_v38 = vpop.eup %1046 }
 0xa9c   :  { %348 = vrot.lane.b32.xlu0 %v1047_v38, %s1151_s17 }
 0xb0e   :  { %v349_v42 = vpop.permute.xlu0 %348 }
 0xb0f   :  { %v351_v43 = vmul.f32 %v349_v42, %v334_v32 }
 0xb11   :  { %353 = vrot.lane.b32.xlu1 %v351_v43, %s1152_s18 }
 0xb83   :  { %v354_v44 = vpop.permute.xlu1 %353 }
 0xb84   :  { %998 = vmatmul.msk.f32.vlgmr.msrb.gmra.mxu0 %vm123_vm3, %v354_v44  ;;  %1005 = vmatmul.msk.f32.gmra.mxu3 %vm123_vm3, %v354_v44 }
 0xc01   :  { %v374_v49 = vpop.f32.mrf.mxu0 }
 0xc02   :  { %v377_v50 = vadd.f32 %v374_v49, %v111_v48 }
 0xc04   :  { %1048 = vtanh.f32 %v377_v50 }
 0xc0a   :  { %v1049_v51 = vpop.eup %1048 }
 0xc0b   :  { %v379_v52 = vmul.f32 %v1049_v51, %v1213_v16 }
 0xc0d   :  { %v380_v53 = vadd.f32 %v379_v52, %v1215_v18 }
 0xc0f   :  { %383 = vrot.lane.b32.xlu2 %v380_v53, %s1151_s17  ;;  %v381_v56 = vmul.f32 %v380_v53, %v345_v37 }
 0xc69   :  { %v384_v54 = vpop.permute.xlu2 %383 }
 0xc6a   :  { %v386_v55 = vmul.f32 %v384_v54, %v380_v53 }
 0xc6c   :  { %388 = vrot.lane.b32.xlu0 %v386_v55, %s1152_s18 }
 0xcde   :  { %v389_v57 = vpop.permute.xlu0 %388 }
 0xcdf   :  { %v391_v58 = vadd.f32 %v389_v57, %v381_v56  ;;  %v524_v56 = vpop.f32.mrf.mxu3 }
 0xce0   :  { %v525_v57 = vadd.f32 %v1334_v6, %v524_v56 }
 0xce1   :  { %1050 = vtanh.f32 %v391_v58 }
 0xce7   :  { %v1051_v59 = vpop.eup %1050 }
 0xce8   :  { %394 = vrot.lane.b32.xlu1 %v1051_v59, %s1151_s17 }
 0xd5a   :  { %v395_v60 = vpop.permute.xlu1 %394 }
 0xd5b   :  { %v397_v61 = vmul.f32 %v395_v60, %v380_v53 }
 0xd5d   :  { %399 = vrot.lane.b32.xlu2 %v397_v61, %s1152_s18 }
 0xdb7   :  { %v400_v2 = vpop.permute.xlu2 %399 }
 0xdb8   :  { %999 = vmatmul.msk.f32.vlgmr.msra.gmra.mxu1 %vm123_vm3, %v400_v2  ;;  %1006 = vmatmul.msk.f32.gmra.mxu3 %vm123_vm3, %v400_v2 }
 0xdb9   :  { %650 = vmatpush.msra.mxu1 %v1306_v62 }
 0xdbb   :  { %651 = vmatpush.msra.mxu1 %v1308_v63 }
 0xdbd   :  { %652 = vmatpush.msra.mxu1 %v1312_v0 }
 0xdbf   :  { %653 = vmatpush.msra.mxu1 %v1316_v1 }
 0xdc0   :  { %562 = vmatmul.f32.vlgmr.msrb.gmra.mxu1 %v1149_v7 }
 0xdc1   :  { %742 = vmatpush.msrb.mxu1 %v1306_v62 }
 0xdc3   :  { %743 = vmatpush.msrb.mxu1 %v1308_v63 }
 0xdc5   :  { %744 = vmatpush.msrb.mxu1 %v1312_v0 }
 0xdc7   :  { %745 = vmatpush.msrb.mxu1 %v1316_v1 }
 0xe35   :  { %v420_v4 = vpop.f32.mrf.mxu1 }
 0xe36   :  { %v423_v5 = vadd.f32 %v420_v4, %v114_v3 }
 0xe38   :  { %1052 = vtanh.f32 %v423_v5 }
 0xe3d   :  { %v563_v11 = vpop.f32.mrf.mxu1 }
 0xe3e   :  { %v1053_v7 = vpop.eup %1052  ;;  %v566_v12 = vadd.f32 %v563_v11, %v519_v10 }
 0xe3f   :  { %v425_v13 = vmul.f32 %v1053_v7, %v1213_v16 }
 0xe40   :  { %1054 = vtanh.f32 %v566_v12 }
 0xe41   :  { %v426_v14 = vadd.f32 %v425_v13, %v1215_v18 }
 0xe43   :  { %429 = vrot.lane.b32.xlu0 %v426_v14, %s1151_s17  ;;  %v427_v24 = vmul.f32 %v426_v14, %v391_v58 }
 0xe46   :  { %v1055_v15 = vpop.eup %1054 }
 0xe47   :  { %v568_v17 = vmul.f32 %v1055_v15, %v1213_v16 }
 0xe49   :  { %v569_v19 = vadd.f32 %v568_v17, %v1215_v18 }
 0xe4b   :  { %572 = vrot.lane.b32.xlu1 %v569_v19, %s1151_s17  ;;  %v570_v28 = vmul.f32 0.0, %v569_v19 }
 0xeb5   :  { %v430_v20 = vpop.permute.xlu0 %429 }
 0xeb6   :  { %v432_v21 = vmul.f32 %v430_v20, %v426_v14 }
 0xeb8   :  { %434 = vrot.lane.b32.xlu2 %v432_v21, %s1152_s18 }
 0xebd   :  { %v573_v22 = vpop.permute.xlu1 %572 }
 0xebe   :  { %v575_v23 = vmul.f32 %v573_v22, %v569_v19 }
 0xec0   :  { %577 = vrot.lane.b32.xlu0 %v575_v23, %s1152_s18 }
 0xf12   :  { %v435_v25 = vpop.permute.xlu2 %434 }
 0xf13   :  { %v1345_v26 = vadd.f32 %v435_v25, %v427_v24 }
 0xf15   :  { %1056 = vtanh.f32 %v1345_v26 }
 0xf1b   :  { %v1057_v27 = vpop.eup %1056 }
 0xf1c   :  { %440 = vrot.lane.b32.xlu1 %v1057_v27, %s1151_s17 }
 0xf32   :  { %v578_v29 = vpop.permute.xlu0 %577 }
 0xf33   :  { %v580_v30 = vadd.f32 %v578_v29, %v570_v28 }
 0xf35   :  { %1058 = vtanh.f32 %v580_v30 }
 0xf3b   :  { %v1059_v31 = vpop.eup %1058 }
 0xf3c   :  { %583 = vrot.lane.b32.xlu2 %v1059_v31, %s1151_s17 }
 0xf8e   :  { %v441_v32 = vpop.permute.xlu1 %440 }
 0xf8f   :  { %v443_v33 = vmul.f32 %v441_v32, %v426_v14  ;;  %v527_v14 = vpop.f32.mrf.mxu3 }
 0xf90   :  { %v528_v15 = vadd.f32 %v1334_v6, %v527_v14 }
 0xf91   :  { %445 = vrot.lane.b32.xlu0 %v443_v33, %s1152_s18 }
 0xf96   :  { %v584_v34 = vpop.permute.xlu2 %583 }
 0xf97   :  { %v586_v35 = vmul.f32 %v584_v34, %v569_v19  ;;  %v530_v29 = vpop.f32.mrf.mxu3 }
 0xf99   :  { %588 = vrot.lane.b32.xlu1 %v586_v35, %s1152_s18 }
0x1003   :  { %v446_v36 = vpop.permute.xlu0 %445 }
0x1004   :  { %1000 = vmatmul.msk.f32.vlgmr.msrb.gmra.mxu2 %vm123_vm3, %v446_v36  ;;  %1007 = vmatmul.msk.f32.gmra.mxu3 %vm123_vm3, %v446_v36 }
0x1005   :  { %696 = vmatpush.msrb.mxu2 %v1306_v62 }
0x1007   :  { %697 = vmatpush.msrb.mxu2 %v1308_v63 }
0x1009   :  { %698 = vmatpush.msrb.mxu2 %v1312_v0 }
0x100b   :  { %v589_v37 = vpop.permute.xlu1 %588  ;;  %699 = vmatpush.msrb.mxu2 %v1316_v1 }
0x100c   :  { %1009 = vmatmul.msk.f32.vlgmr.msra.gmra.mxu2 %vm123_vm3, %v589_v37 }
0x100d   :  { %788 = vmatpush.msra.mxu2 %v1306_v62 }
0x100f   :  { %789 = vmatpush.msra.mxu2 %v1308_v63 }
0x1011   :  { %790 = vmatpush.msra.mxu2 %v1312_v0 }
0x1013   :  { %791 = vmatpush.msra.mxu2 %v1316_v1 }
0x1087   :  { %v1363_v38 = vpop.f32.mrf.mxu2 }
0x108f   :  { %v609_v41 = vpop.f32.mrf.mxu2 }
0x1090   :  { %v612_v42 = vadd.f32 %v609_v41, %v522_v40 }
0x1092   :  { %1060 = vtanh.f32 %v612_v42 }
0x1098   :  { %v1061_v43 = vpop.eup %1060 }
0x1099   :  { %v614_v44 = vmul.f32 %v1061_v43, %v1213_v16 }
0x109b   :  { %v615_v45 = vadd.f32 %v614_v44, %v1215_v18 }
0x109d   :  { %618 = vrot.lane.b32.xlu2 %v615_v45, %s1151_s17  ;;  %v616_v49 = vmul.f32 %v615_v45, %v580_v30  ;;  %v531_v30 = vadd.f32 %v1334_v6, %v530_v29 }
0x10f7   :  { %v619_v46 = vpop.permute.xlu2 %618 }
0x10f8   :  { %v621_v48 = vmul.f32 %v619_v46, %v615_v45  ;;  %v533_v46 = vpop.f32.mrf.mxu3 }
0x10fa   :  { %623 = vrot.lane.b32.xlu0 %v621_v48, %s1152_s18  ;;  %v534_v48 = vadd.f32 %v1334_v6, %v533_v46 }
0x116c   :  { %v624_v50 = vpop.permute.xlu0 %623 }
0x116d   :  { %v626_v51 = vadd.f32 %v624_v50, %v616_v49 }
0x116f   :  { %1062 = vtanh.f32 %v626_v51 }
0x1175   :  { %v1063_v52 = vpop.eup %1062 }
0x1176   :  { %629 = vrot.lane.b32.xlu1 %v1063_v52, %s1151_s17 }
0x11e8   :  { %v630_v53 = vpop.permute.xlu1 %629 }
0x11e9   :  { %v632_v54 = vmul.f32 %v630_v53, %v615_v45 }
0x11eb   :  { %634 = vrot.lane.b32.xlu2 %v632_v54, %s1152_s18  ;;  %v117_v54 = vadd.f32 %v1209_v8, %v1297_v47 }
0x1245   :  { %v635_v55 = vpop.permute.xlu2 %634 }
0x1246   :  { %1010 = vmatmul.msk.f32.vlgmr.msra.gmra.mxu1 %vm123_vm3, %v635_v55  ;;  %v469_v55 = vadd.f32 %v1363_v38, %v117_v54 }
0x1247   :  { %834 = vmatpush.msra.mxu1 %v1306_v62 }
0x1249   :  { %835 = vmatpush.msra.mxu1 %v1308_v63 }
0x124b   :  { %836 = vmatpush.msra.mxu1 %v1312_v0 }
0x124d   :  { %837 = vmatpush.msra.mxu1 %v1316_v1 }
0x12c3   :  { %v655_v58 = vpop.f32.mrf.mxu1 }
0x12c4   :  { %v658_v59 = vadd.f32 %v655_v58, %v525_v57 }
0x12c6   :  { %1064 = vtanh.f32 %v658_v59 }
0x12cc   :  { %v1065_v60 = vpop.eup %1064 }
0x12cd   :  { %v660_v61 = vmul.f32 %v1065_v60, %v1213_v16 }
0x12cf   :  { %v661_v2 = vadd.f32 %v660_v61, %v1215_v18 }
0x12d1   :  { %664 = vrot.lane.b32.xlu0 %v661_v2, %s1151_s17  ;;  %v662_v5 = vmul.f32 %v661_v2, %v626_v51 }
0x1343   :  { %v665_v3 = vpop.permute.xlu0 %664 }
0x1344   :  { %v667_v4 = vmul.f32 %v665_v3, %v661_v2 }
0x1346   :  { %669 = vrot.lane.b32.xlu1 %v667_v4, %s1152_s18 }
0x13b8   :  { %v670_v9 = vpop.permute.xlu1 %669 }
0x13b9   :  { %v672_v10 = vadd.f32 %v670_v9, %v662_v5 }
0x13bb   :  { %1066 = vtanh.f32 %v672_v10 }
0x13c1   :  { %v1067_v11 = vpop.eup %1066 }
0x13c2   :  { %675 = vrot.lane.b32.xlu2 %v1067_v11, %s1151_s17 }
0x141c   :  { %v676_v7 = vpop.permute.xlu2 %675 }
0x141d   :  { %v678_v12 = vmul.f32 %v676_v7, %v661_v2 }
0x141f   :  { %680 = vrot.lane.b32.xlu0 %v678_v12, %s1152_s18 }
0x1491   :  { %v681_v13 = vpop.permute.xlu0 %680 }
0x1492   :  { %1011 = vmatmul.msk.f32.vlgmr.msrb.gmra.mxu2 %vm123_vm3, %v681_v13 }
0x1493   :  { %880 = vmatpush.msrb.mxu2 %v1306_v62 }
0x1495   :  { %881 = vmatpush.msrb.mxu2 %v1308_v63 }
0x1497   :  { %882 = vmatpush.msrb.mxu2 %v1312_v0 }
0x1499   :  { %883 = vmatpush.msrb.mxu2 %v1316_v1 }
0x1515   :  { %v701_v17 = vpop.f32.mrf.mxu2 }
0x1516   :  { %v704_v19 = vadd.f32 %v701_v17, %v528_v15 }
0x1518   :  { %1068 = vtanh.f32 %v704_v19 }
0x151e   :  { %v1069_v20 = vpop.eup %1068 }
0x151f   :  { %v706_v21 = vmul.f32 %v1069_v20, %v1213_v16 }
0x1521   :  { %v707_v22 = vadd.f32 %v706_v21, %v1215_v18 }
0x1523   :  { %710 = vrot.lane.b32.xlu1 %v707_v22, %s1151_s17  ;;  %v708_v63 = vmul.f32 %v707_v22, %v672_v10  ;;  %v536_v10 = vpop.f32.mrf.mxu3 }
0x1524   :  { %v537_v11 = vadd.f32 %v1334_v6, %v536_v10 }
0x1595   :  { %v711_v62 = vpop.permute.xlu1 %710 }
0x1596   :  { %v713_v23 = vmul.f32 %v711_v62, %v707_v22 }
0x1598   :  { %715 = vrot.lane.b32.xlu2 %v713_v23, %s1152_s18 }
0x15f2   :  { %v716_v0 = vpop.permute.xlu2 %715 }
0x15f3   :  { %v718_v1 = vadd.f32 %v716_v0, %v708_v63 }
0x15f5   :  { %1070 = vtanh.f32 %v718_v1 }
0x15fb   :  { %v1071_v24 = vpop.eup %1070 }
0x15fc   :  { %721 = vrot.lane.b32.xlu0 %v1071_v24, %s1151_s17 }
0x166e   :  { %v722_v25 = vpop.permute.xlu0 %721 }
0x166f   :  { %v724_v27 = vmul.f32 %v722_v25, %v707_v22 }
0x1671   :  { %726 = vrot.lane.b32.xlu1 %v724_v27, %s1152_s18 }
0x16e3   :  { %v727_v28 = vpop.permute.xlu1 %726 }
0x16e4   :  { %1012 = vmatmul.msk.f32.vlgmr.msrb.gmra.mxu1 %vm123_vm3, %v727_v28 }
0x1761   :  { %v747_v31 = vpop.f32.mrf.mxu1 }
0x1762   :  { %v750_v32 = vadd.f32 %v747_v31, %v531_v30 }
0x1764   :  { %1072 = vtanh.f32 %v750_v32 }
0x176a   :  { %v1073_v33 = vpop.eup %1072 }
0x176b   :  { %v752_v34 = vmul.f32 %v1073_v33, %v1213_v16 }
0x176d   :  { %v753_v35 = vadd.f32 %v752_v34, %v1215_v18 }
0x176f   :  { %756 = vrot.lane.b32.xlu2 %v753_v35, %s1151_s17  ;;  %v754_v39 = vmul.f32 %v753_v35, %v718_v1 }
0x17c9   :  { %v757_v36 = vpop.permute.xlu2 %756 }
0x17ca   :  { %v759_v37 = vmul.f32 %v757_v36, %v753_v35 }
0x17cc   :  { %761 = vrot.lane.b32.xlu0 %v759_v37, %s1152_s18 }
0x183e   :  { %v762_v40 = vpop.permute.xlu0 %761 }
0x183f   :  { %v764_v41 = vadd.f32 %v762_v40, %v754_v39 }
0x1841   :  { %1074 = vtanh.f32 %v764_v41 }
0x1847   :  { %v1075_v42 = vpop.eup %1074 }
0x1848   :  { %767 = vrot.lane.b32.xlu1 %v1075_v42, %s1151_s17 }
0x18ba   :  { %v768_v43 = vpop.permute.xlu1 %767 }
0x18bb   :  { %v770_v44 = vmul.f32 %v768_v43, %v753_v35 }
0x18bd   :  { %772 = vrot.lane.b32.xlu2 %v770_v44, %s1152_s18  ;;  %v911_v44 = vld [vmem:[#allocation2 + $0x90] sm:$0xff] }
0x1917   :  { %v773_v45 = vpop.permute.xlu2 %772 }
0x1918   :  { %1013 = vmatmul.msk.f32.vlgmr.msra.gmra.mxu2 %vm123_vm3, %v773_v45  ;;  %v910_v45 = vld [vmem:[#allocation2 + $0x88] sm:$0xff] }
0x199b   :  { %v793_v49 = vpop.f32.mrf.mxu2 }
0x199c   :  { %v796_v50 = vadd.f32 %v793_v49, %v534_v48  ;;  %v1027_v49 = vld [vmem:[#allocation2 + $0xa0] ss:$0 sm:$0xff] }
0x199e   :  { %1076 = vtanh.f32 %v796_v50 }
0x199f   :  { %1078 = vtanh.f32 %v469_v55 }
0x19a4   :  { %v1077_v51 = vpop.eup %1076 }
0x19a5   :  { %v798_v52 = vmul.f32 %v1077_v51, %v1213_v16  ;;  %v1079_v58 = vpop.eup %1078 }
0x19a6   :  { %v471_v59 = vmul.f32 %v1079_v58, %v1213_v16 }
0x19a7   :  { %v799_v53 = vadd.f32 %v798_v52, %v1215_v18 }
0x19a8   :  { %v472_v60 = vadd.f32 %v471_v59, %v1215_v18 }
0x19a9   :  { %802 = vrot.lane.b32.xlu0 %v799_v53, %s1151_s17  ;;  %v800_v61 = vmul.f32 %v799_v53, %v764_v41 }
0x19aa   :  { %v473_v15 = vmul.f32 %v472_v60, %v1345_v26 }
0x1a1b   :  { %v803_v56 = vpop.permute.xlu0 %802 }
0x1a1c   :  { %v805_v57 = vmul.f32 %v803_v56, %v799_v53 }
0x1a1e   :  { %807 = vrot.lane.b32.xlu1 %v805_v57, %s1152_s18 }
0x1a26   :  { %475 = vrot.lane.b32.xlu1 %v472_v60, %s1151_s17 }
0x1a90   :  { %v808_v2 = vpop.permute.xlu1 %807 }
0x1a91   :  { %v810_v3 = vadd.f32 %v808_v2, %v800_v61 }
0x1a93   :  { %1080 = vtanh.f32 %v810_v3 }
0x1a98   :  { %v476_v38 = vpop.permute.xlu1 %475 }
0x1a99   :  { %v1081_v4 = vpop.eup %1080  ;;  %v478_v5 = vmul.f32 %v476_v38, %v472_v60 }
0x1a9a   :  { %813 = vrot.lane.b32.xlu2 %v1081_v4, %s1151_s17 }
0x1af4   :  { %v814_v8 = vpop.permute.xlu2 %813 }
0x1af5   :  { %v816_v47 = vmul.f32 %v814_v8, %v799_v53 }
0x1af7   :  { %818 = vrot.lane.b32.xlu0 %v816_v47, %s1152_s18 }
0x1aff   :  { %480 = vrot.lane.b32.xlu0 %v478_v5, %s1152_s18 }
0x1b69   :  { %v819_v9 = vpop.permute.xlu0 %818 }
0x1b6a   :  { %1014 = vmatmul.msk.f32.vlgmr.msra.gmra.mxu1 %vm123_vm3, %v819_v9 }
0x1b71   :  { %v481_v13 = vpop.permute.xlu0 %480 }
0x1b72   :  { %v483_v19 = vadd.f32 %v481_v13, %v473_v15 }
0x1be7   :  { %v839_v7 = vpop.f32.mrf.mxu1 }
0x1be8   :  { %v842_v12 = vadd.f32 %v839_v7, %v537_v11 }
0x1bea   :  { %1082 = vtanh.f32 %v842_v12 }
0x1beb   :  { %1084 = vtanh.f32 %v483_v19 }
0x1bf0   :  { %v1083_v14 = vpop.eup %1082 }
0x1bf1   :  { %v844_v17 = vmul.f32 %v1083_v14, %v1213_v16  ;;  %v1085_v21 = vpop.eup %1084 }
0x1bf3   :  { %v845_v20 = vadd.f32 %v844_v17, %v1215_v18 }
0x1bf5   :  { %848 = vrot.lane.b32.xlu2 %v845_v20, %s1151_s17  ;;  %v846_v26 = vmul.f32 %v845_v20, %v810_v3 }
0x1bfd   :  { %486 = vrot.lane.b32.xlu2 %v1085_v21, %s1151_s17 }
0x1c4f   :  { %v849_v22 = vpop.permute.xlu2 %848 }
0x1c50   :  { %v851_v62 = vmul.f32 %v849_v22, %v845_v20 }
0x1c52   :  { %853 = vrot.lane.b32.xlu1 %v851_v62, %s1152_s18 }
0x1c57   :  { %v487_v23 = vpop.permute.xlu2 %486 }
0x1c58   :  { %v489_v63 = vmul.f32 %v487_v23, %v472_v60 }
0x1c5a   :  { %497 = vrot.lane.b32.xlu1 %v489_v63, %s1152_s18 }
0x1cc4   :  { %v854_v0 = vpop.permute.xlu1 %853 }
0x1cc5   :  { %v856_v1 = vadd.f32 %v854_v0, %v846_v26 }
0x1cc7   :  { %1086 = vtanh.f32 %v856_v1 }
0x1ccc   :  { %v498_v24 = vpop.permute.xlu1 %497 }
0x1ccd   :  { %v1087_v25 = vpop.eup %1086  ;;  %1008 = vmatmul.msk.f32.gmra.mxu3 %vm123_vm3, %v498_v24 }
0x1cce   :  { %859 = vrot.lane.b32.xlu0 %v1087_v25, %s1151_s17 }
0x1d40   :  { %v860_v27 = vpop.permute.xlu0 %859 }
0x1d41   :  { %v862_v28 = vmul.f32 %v860_v27, %v845_v20 }
0x1d43   :  { %864 = vrot.lane.b32.xlu2 %v862_v28, %s1152_s18 }
0x1d50   :  { %v539_v30 = vpop.f32.mrf.mxu3 }
0x1d51   :  { %v540_v31 = vadd.f32 %v1334_v6, %v539_v30  ;;  %v912_v6 = vld [vmem:[#allocation2 + $0x98] sm:$0xff] }
0x1d52   :  { %932 = vmatpush.msrb.mxu1 %v912_v6 }
0x1d54   :  { %933 = vmatpush.msrb.mxu1 %v911_v44 }
0x1d56   :  { %934 = vmatpush.msrb.mxu1 %v910_v45 }
0x1d9d   :  { %v865_v29 = vpop.permute.xlu2 %864 }
0x1d9e   :  { %1015 = vmatmul.msk.f32.vlgmr.msrb.gmra.mxu2 %vm123_vm3, %v865_v29 }
0x1e21   :  { %v885_v32 = vpop.f32.mrf.mxu2 }
0x1e22   :  { %v888_v33 = vadd.f32 %v885_v32, %v540_v31 }
0x1e24   :  { %1088 = vtanh.f32 %v888_v33 }
0x1e2a   :  { %v1089_v34 = vpop.eup %1088 }
0x1e2b   :  { %v890_v35 = vmul.f32 %v1089_v34, %v1213_v16  ;;  %v909_v16 = vld [vmem:[#allocation2 + $0x80] sm:$0xff] }
0x1e2c   :  { %935 = vmatpush.msrb.mxu1 %v909_v16 }
0x1e2d   :  { %v891_v36 = vadd.f32 %v890_v35, %v1215_v18 }
0x1e2f   :  { %894 = vrot.lane.b32.xlu0 %v891_v36, %s1151_s17  ;;  %v892_v40 = vmul.f32 %v891_v36, %v856_v1 }
0x1ea1   :  { %v895_v37 = vpop.permute.xlu0 %894 }
0x1ea2   :  { %v897_v39 = vmul.f32 %v895_v37, %v891_v36 }
0x1ea4   :  { %899 = vrot.lane.b32.xlu1 %v897_v39, %s1152_s18 }
0x1f16   :  { %v900_v41 = vpop.permute.xlu1 %899 }
0x1f17   :  { %v902_v42 = vadd.f32 %v900_v41, %v892_v40 }
0x1f19   :  { %1090 = vtanh.f32 %v902_v42 }
0x1f1f   :  { %v1091_v43 = vpop.eup %1090 }
0x1f20   :  { %905 = vrot.lane.b32.xlu2 %v1091_v43, %s1151_s17 }
0x1f7a   :  { %v906_v18 = vpop.permute.xlu2 %905 }
0x1f7b   :  { %v908_v46 = vmul.f32 %v906_v18, %v891_v36 }
0x1f7d   :  { %916 = vrot.lane.b32.xlu0 %v908_v46, %s1152_s18 }
0x1fef   :  { %v917_v48 = vpop.permute.xlu0 %916 }
0x1ff0   :  { %1016 = vmatmul.msk.f32.vlgmr.msrb.gmra.mxu1 %vm123_vm3, %v917_v48 }
0x206d   :  { %v937_v50 = vpop.f32.mrf.mxu1 }
0x206e   :  { %v938_v51 = vadd.f32 %v1027_v49, %v937_v50 }
0x2070   :  { %v940_v52 = vmul.f32 %v938_v51, %v938_v51 }
0x2072   :  { %941 = vadd.xlane.f32.xlu1 %v940_v52 }
0x20e5   :  { %v942_v53 = vpop.xlane.xlu1 %941 }
0x20e6   :  { %1092 = vrsqrt.f32 %v942_v53  ;;  %vm949_vm5 = vweird.f32 %v942_v53 }
0x20ec   :  { %v1093_v54 = vpop.eup %1092 }
0x20ed   :  { %v944_v55 = vmul.f32 %v1093_v54, %v942_v53  ;;  %vm950_vm4 = vweird.f32 %v1093_v54 }
0x20ee   :  { %vm951_vm6 = vmor %vm949_vm5, %vm950_vm4 }
0x20ef   :  { %v945_v56 = vmul.f32 %v1093_v54, %v944_v55 }
0x20f1   :  { %v946_v57 = vmul.f32 0.5, %v945_v56 }
0x20f3   :  { %v947_v58 = vsub.f32 1.5, %v946_v57 }
0x20f5   :  { %v948_v59 = vmul.f32 %v1093_v54, %v947_v58 }
0x20f7   :  { %v952_v60 = vsel %vm951_vm6, %v1093_v54, %v948_v59 }
0x20f8   :  { %v953_v61 = vmul.f32 %v952_v60, %v938_v51 }
0x20fa   :  { %v954_v2 = vrot.slane %v953_v61, 4 }
0x20fc   :  { %v955_v3 = vadd.f32 %v954_v2, %v953_v61 }
0x20fe   :  { %v956_v4 = vrot.slane %v955_v3, 2 }
0x2100   :  { %v957_v8 = vadd.f32 %v956_v4, %v955_v3 }
0x2102   :  { %v958_v47 = vrot.slane %v957_v8, 1 }
0x2104   :  { %v959_v38 = vadd.f32 %v958_v47, %v957_v8 }
0x2106   :  { %v960_v5 = vmul.f32 0.125, %v959_v38 }
0x2108   :  { %961 = vst [vmem:[#allocation5] sm:$0x1] %v960_v5 }
0x2109   :  { %972 = dma.vmem_to_hbm [thread:$0]  %s968_s5, 16, %s970_s8, [#allocation4]  }
0x210a   :  { %1144 = dma.done.wait [#allocation4], 16  }
0x210b   :  { %1145 = vsyncadd [#allocation4], 4294967280 }
0x210c   :  { %977 = vsyncpa [#allocation3], 1 }
0x210d   :  { %978 = vsyncpa [#allocation4], 1 }

</bundles_post_ra>
